<compile_context>
chip_gen: v7x
topology: tpu7x:2x2x1
jax: 0.10.0
libtpu: 0.0.40
codegen_flags: <defaults>
</compile_context>

<pallas_src>
import math

import jax
import jax.numpy as jnp
from jax.experimental import pallas as pl
from jax.experimental.pallas import tpu as pltpu


def _round_up(x, m):
    return ((x + m - 1) // m) * m


def _pick_tile(n, preferred):
    """Largest multiple of 8 that divides n (n must be a multiple of 8) and is
    <= preferred."""
    c = min(preferred, n)
    c -= c % 8
    while c >= 8 and n % c != 0:
        c -= 8
    return max(c, 8)


def make_rnn_kernel(tc, tb, nsub):
    """Build the recurrence kernel for a (tc timesteps) x (tb batch rows) chunk,
    with `nsub` independent batch sub-tiles interleaved per step."""
    tb_sub = tb // nsub

    def rnn_kernel(pre_ref, h0_ref, whh_ref, out_ref, h_scratch):
        # pre_ref  : (tc, tb, Hp) f32  time-major pre-activations (x@W_ih + b)
        # h0_ref   : (tb, Hp)     f32  initial hidden state for this batch tile
        # whh_ref  : (Hp, Hp)     f32  recurrent weights (resident across grid)
        # out_ref  : (tc, tb, Hp) f32  time-major output chunk (dense stores)
        # h_scratch: (tb, Hp)     f32  hidden-state carry across time chunks
        c = pl.program_id(1)  # time-chunk index (innermost, sequential)

        @pl.when(c == 0)
        def _():
            h_scratch[...] = h0_ref[...]

        w_hh = whh_ref[...]  # same RHS every timestep

        # Independent per-sub-tile carries: the dot->add->tanh chains of
        # different sub-tiles are independent, so the scheduler can overlap
        # sub-tile A's MXU work with sub-tile B's tanh/add.
        hs = [h_scratch[s * tb_sub:(s + 1) * tb_sub, :] for s in range(nsub)]

        # Fully-unrolled static inner loop (tc is kept moderate by the wrapper)
        # -> static indices, dense lane/sublane stores, full scheduler
        # visibility across sub-tiles.
        for i in range(tc):
            accs = [
                pre_ref[i, s * tb_sub:(s + 1) * tb_sub, :]
                + jnp.dot(hs[s], w_hh, preferred_element_type=jnp.float32)
                for s in range(nsub)
            ]
            hs = [jnp.tanh(a) for a in accs]
            for s in range(nsub):
                out_ref[i, s * tb_sub:(s + 1) * tb_sub, :] = (
                    hs[s].astype(out_ref.dtype))

        for s in range(nsub):
            h_scratch[s * tb_sub:(s + 1) * tb_sub, :] = hs[s]

    return rnn_kernel


def vanilla_rnn_forward(inputs, initial_state, w_ih, w_hh, b_ih, b_hh):
    """inputs: (B, T, D), initial_state: (B, H) -> (B, T, H)"""
    B, T, D = inputs.shape
    H = initial_state.shape[1]
    out_dtype = inputs.dtype

    # --- pad to hardware-friendly extents (sliced back at the end) ---
    Bp = _round_up(B, 8)       # sublane-dense batch
    Tp = _round_up(T, 8)       # even time chunking
    Hp = _round_up(H, 128)     # lane-dense hidden dim

    TB = _pick_tile(Bp, 256)   # batch tile (parallel axis; megacore on v7x)
    TC = _pick_tile(Tp, 32)    # timesteps per grid step (amortizes overhead)
    nsub = 2 if (TB % 16 == 0) else 1   # >=8 rows per interleaved sub-tile

    f32 = jnp.float32
    x = jnp.pad(inputs.astype(f32), ((0, Bp - B), (0, Tp - T), (0, 0)))
    h0 = jnp.pad(initial_state.astype(f32), ((0, Bp - B), (0, Hp - H)))
    w_ih_p = jnp.pad(w_ih.astype(f32), ((0, 0), (0, Hp - H)))
    w_hh_p = jnp.pad(w_hh.astype(f32), ((0, Hp - H), (0, Hp - H)))
    bias = jnp.pad((b_ih + b_hh).astype(f32), (0, Hp - H))

    # Hoist the time-independent input projection out of the recurrence:
    # one (B*T, D) x (D, H) matmul at full MXU occupancy, emitted time-major.
    # (f32 operands everywhere: avoids the unsupported BF16xBF16=F32 dot.)
    pre = jnp.einsum("btd,dh->tbh", x, w_ih_p,
                     preferred_element_type=jnp.float32) + bias

    grid = (Bp // TB, Tp // TC)

    # Explicit VMEM budget: double-buffered pre/out/h0/W_hh blocks + carry.
    blk_bytes = 4 * (2 * TC * TB * Hp + TB * Hp + Hp * Hp)
    vmem_limit = min(128 * 1024 * 1024,
                     max(32 * 1024 * 1024,
                         2 * blk_bytes + 4 * TB * Hp + (1 << 20)))

    out_tm = pl.pallas_call(
        make_rnn_kernel(TC, TB, nsub),
        out_shape=jax.ShapeDtypeStruct((Tp, Bp, Hp), f32),
        grid_spec=pltpu.PrefetchScalarGridSpec(
            num_scalar_prefetch=0,
            grid=grid,
            in_specs=[
                pl.BlockSpec((TC, TB, Hp), lambda b, c: (c, b, 0)),  # pre-activations
                pl.BlockSpec((TB, Hp), lambda b, c: (b, 0)),         # h0 per batch tile
                pl.BlockSpec((Hp, Hp), lambda b, c: (0, 0)),         # W_hh (resident)
            ],
            out_specs=pl.BlockSpec((TC, TB, Hp), lambda b, c: (c, b, 0)),
            scratch_shapes=[pltpu.VMEM((TB, Hp), f32)],              # hidden carry
        ),
        compiler_params=pltpu.CompilerParams(
            # batch tiles independent; time chunks carry state -> sequential
            dimension_semantics=("parallel", "arbitrary"),
            vmem_limit_bytes=int(vmem_limit),
        ),
    )(pre, h0, w_hh_p)

    # Single transpose back to batch-major, then strip the padding.
    out = jnp.transpose(out_tm, (1, 0, 2))[:B, :T, :H]
    return out.astype(out_dtype)


def reference_rnn(inputs, initial_state, w_ih, w_hh, b_ih, b_hh):
    B, T, D = inputs.shape
    h = initial_state
    outs = []
    for t in range(T):
        h = jnp.tanh(inputs[:, t, :] @ w_ih + b_ih + h @ w_hh + b_hh)
        outs.append(h)
    return jnp.stack(outs, axis=1)


if __name__ == "__main__":
    # Small shapes consistent with the module's forward.
    B, T, D, H = 4, 8, 16, 32
    key = jax.random.PRNGKey(0)
    k_x, k_h0, k_wih, k_whh, k_bih, k_bhh = jax.random.split(key, 6)

    # Deterministic parameter init matching RNNCell.reset_parameters:
    # uniform(-1/sqrt(H), 1/sqrt(H))
    stdv = 1.0 / math.sqrt(H)
    w_ih = jax.random.uniform(k_wih, (D, H), jnp.float32, -stdv, stdv)
    w_hh = jax.random.uniform(k_whh, (H, H), jnp.float32, -stdv, stdv)
    b_ih = jax.random.uniform(k_bih, (H,), jnp.float32, -stdv, stdv)
    b_hh = jax.random.uniform(k_bhh, (H,), jnp.float32, -stdv, stdv)

    inputs = jax.random.normal(k_x, (B, T, D), jnp.float32)
    h0 = jax.random.normal(k_h0, (B, H), jnp.float32)

    fwd = jax.jit(vanilla_rnn_forward)
    out = fwd(inputs, h0, w_ih, w_hh, b_ih, b_hh)
    out = jax.block_until_ready(out)

    ref = reference_rnn(inputs, h0, w_ih, w_hh, b_ih, b_hh)
    assert out.shape == (B, T, H)
    max_err = float(jnp.max(jnp.abs(out - ref)))
    assert max_err < 1e-3, f"mismatch vs reference: max_err={max_err}"

    print("KERNEL_OK")
</pallas_src>

<mosaic_0001>
module attributes {stable_mosaic.version = 11 : i64} {
  func.func @rnn_kernel(%arg0: i32, %arg1: i32, %arg2: memref<8x8x128xf32, #tpu.memory_space<vmem>>, %arg3: memref<8x128xf32, #tpu.memory_space<vmem>>, %arg4: memref<128x128xf32, #tpu.memory_space<vmem>>, %arg5: memref<8x8x128xf32, #tpu.memory_space<vmem>>, %arg6: memref<8x128xf32, #tpu.memory_space<vmem>>) attributes {dimension_semantics = [#tpu.dimension_semantics<parallel>, #tpu.dimension_semantics<arbitrary>], iteration_bounds = array<i64: 1, 1>, scalar_prefetch = 0 : i64, scratch_operands = 1 : i64, tpu.core_type = #tpu.core_type<tc>, window_params = [{transform_indices = @transform_0, window_bounds = array<i64: 8, 8, 128>}, {transform_indices = @transform_1, window_bounds = array<i64: 8, 128>}, {pipeline_mode = #tpu.pipeline_mode<synchronous>, transform_indices = @transform_2, window_bounds = array<i64: 128, 128>}, {transform_indices = @transform_3, window_bounds = array<i64: 8, 8, 128>}]} {
    %c0_i32 = arith.constant 0 : i32
    %0 = arith.cmpi eq, %arg1, %c0_i32 : i32
    %1 = arith.extui %0 : i1 to i32
    %c0_i32_0 = arith.constant 0 : i32
    %2 = arith.cmpi ne, %1, %c0_i32_0 : i32
    scf.if %2 {
      %c0_54 = arith.constant 0 : index
      %c0_55 = arith.constant 0 : index
      %70 = vector.load %arg3[%c0_54, %c0_55] : memref<8x128xf32, #tpu.memory_space<vmem>>, vector<8x128xf32>
      %c0_56 = arith.constant 0 : index
      %c0_57 = arith.constant 0 : index
      %71 = vector.load %arg6[%c0_56, %c0_57] : memref<8x128xf32, #tpu.memory_space<vmem>>, vector<8x128xf32>
      tpu.vector_store %arg6[%c0_56, %c0_57], %70 {strides = array<i32>} : memref<8x128xf32, #tpu.memory_space<vmem>>, vector<8x128xf32>,
    } else {
    }
    %c0 = arith.constant 0 : index
    %c0_1 = arith.constant 0 : index
    %3 = vector.load %arg4[%c0, %c0_1] : memref<128x128xf32, #tpu.memory_space<vmem>>, vector<128x128xf32>
    %c0_2 = arith.constant 0 : index
    %c0_3 = arith.constant 0 : index
    %4 = vector.load %arg6[%c0_2, %c0_3] : memref<8x128xf32, #tpu.memory_space<vmem>>, vector<8x128xf32>
    %c0_4 = arith.constant 0 : index
    %c0_5 = arith.constant 0 : index
    %c0_6 = arith.constant 0 : index
    %5 = vector.load %arg2[%c0_4, %c0_5, %c0_6] : memref<8x8x128xf32, #tpu.memory_space<vmem>>, vector<1x8x128xf32>
    %6 = vector.shape_cast %5 : vector<1x8x128xf32> to vector<8x128xf32>
    %cst = arith.constant dense<0.000000e+00> : vector<8x128xf32>
    %7 = tpu.matmul %4, %3, %cst {dimension_numbers = #tpu.dot_dimension_numbers<[1], [0], [0], [1], [0, 0, 1, 1], [], []>} : vector<8x128xf32>, vector<128x128xf32>, vector<8x128xf32> -> vector<8x128xf32>
    %8 = arith.addf %6, %7 : vector<8x128xf32>
    %9 = math.tanh %8 : vector<8x128xf32>
    %c0_7 = arith.constant 0 : index
    %c0_8 = arith.constant 0 : index
    %c0_9 = arith.constant 0 : index
    %10 = vector.load %arg5[%c0_7, %c0_8, %c0_9] : memref<8x8x128xf32, #tpu.memory_space<vmem>>, vector<1x8x128xf32>
    %11 = vector.shape_cast %10 : vector<1x8x128xf32> to vector<8x128xf32>
    %12 = vector.shape_cast %9 : vector<8x128xf32> to vector<1x8x128xf32>
    tpu.vector_store %arg5[%c0_7, %c0_8, %c0_9], %12 {strides = array<i32>} : memref<8x8x128xf32, #tpu.memory_space<vmem>>, vector<1x8x128xf32>,
    %c1 = arith.constant 1 : index
    %c0_10 = arith.constant 0 : index
    %c0_11 = arith.constant 0 : index
    %13 = vector.load %arg2[%c1, %c0_10, %c0_11] : memref<8x8x128xf32, #tpu.memory_space<vmem>>, vector<1x8x128xf32>
    %14 = vector.shape_cast %13 : vector<1x8x128xf32> to vector<8x128xf32>
    %cst_12 = arith.constant dense<0.000000e+00> : vector<8x128xf32>
    %15 = tpu.matmul %9, %3, %cst_12 {dimension_numbers = #tpu.dot_dimension_numbers<[1], [0], [0], [1], [0, 0, 1, 1], [], []>} : vector<8x128xf32>, vector<128x128xf32>, vector<8x128xf32> -> vector<8x128xf32>
    %16 = arith.addf %14, %15 : vector<8x128xf32>
    %17 = math.tanh %16 : vector<8x128xf32>
    %c1_13 = arith.constant 1 : index
    %c0_14 = arith.constant 0 : index
    %c0_15 = arith.constant 0 : index
    %18 = vector.load %arg5[%c1_13, %c0_14, %c0_15] : memref<8x8x128xf32, #tpu.memory_space<vmem>>, vector<1x8x128xf32>
    %19 = vector.shape_cast %18 : vector<1x8x128xf32> to vector<8x128xf32>
    %20 = vector.shape_cast %17 : vector<8x128xf32> to vector<1x8x128xf32>
    tpu.vector_store %arg5[%c1_13, %c0_14, %c0_15], %20 {strides = array<i32>} : memref<8x8x128xf32, #tpu.memory_space<vmem>>, vector<1x8x128xf32>,
    %c2 = arith.constant 2 : index
    %c0_16 = arith.constant 0 : index
    %c0_17 = arith.constant 0 : index
    %21 = vector.load %arg2[%c2, %c0_16, %c0_17] : memref<8x8x128xf32, #tpu.memory_space<vmem>>, vector<1x8x128xf32>
    %22 = vector.shape_cast %21 : vector<1x8x128xf32> to vector<8x128xf32>
    %cst_18 = arith.constant dense<0.000000e+00> : vector<8x128xf32>
    %23 = tpu.matmul %17, %3, %cst_18 {dimension_numbers = #tpu.dot_dimension_numbers<[1], [0], [0], [1], [0, 0, 1, 1], [], []>} : vector<8x128xf32>, vector<128x128xf32>, vector<8x128xf32> -> vector<8x128xf32>
    %24 = arith.addf %22, %23 : vector<8x128xf32>
    %25 = math.tanh %24 : vector<8x128xf32>
    %c2_19 = arith.constant 2 : index
    %c0_20 = arith.constant 0 : index
    %c0_21 = arith.constant 0 : index
    %26 = vector.load %arg5[%c2_19, %c0_20, %c0_21] : memref<8x8x128xf32, #tpu.memory_space<vmem>>, vector<1x8x128xf32>
    %27 = vector.shape_cast %26 : vector<1x8x128xf32> to vector<8x128xf32>
    %28 = vector.shape_cast %25 : vector<8x128xf32> to vector<1x8x128xf32>
    tpu.vector_store %arg5[%c2_19, %c0_20, %c0_21], %28 {strides = array<i32>} : memref<8x8x128xf32, #tpu.memory_space<vmem>>, vector<1x8x128xf32>,
    %c3 = arith.constant 3 : index
    %c0_22 = arith.constant 0 : index
    %c0_23 = arith.constant 0 : index
    %29 = vector.load %arg2[%c3, %c0_22, %c0_23] : memref<8x8x128xf32, #tpu.memory_space<vmem>>, vector<1x8x128xf32>
    %30 = vector.shape_cast %29 : vector<1x8x128xf32> to vector<8x128xf32>
    %cst_24 = arith.constant dense<0.000000e+00> : vector<8x128xf32>
    %31 = tpu.matmul %25, %3, %cst_24 {dimension_numbers = #tpu.dot_dimension_numbers<[1], [0], [0], [1], [0, 0, 1, 1], [], []>} : vector<8x128xf32>, vector<128x128xf32>, vector<8x128xf32> -> vector<8x128xf32>
    %32 = arith.addf %30, %31 : vector<8x128xf32>
    %33 = math.tanh %32 : vector<8x128xf32>
    %c3_25 = arith.constant 3 : index
    %c0_26 = arith.constant 0 : index
    %c0_27 = arith.constant 0 : index
    %34 = vector.load %arg5[%c3_25, %c0_26, %c0_27] : memref<8x8x128xf32, #tpu.memory_space<vmem>>, vector<1x8x128xf32>
    %35 = vector.shape_cast %34 : vector<1x8x128xf32> to vector<8x128xf32>
    %36 = vector.shape_cast %33 : vector<8x128xf32> to vector<1x8x128xf32>
    tpu.vector_store %arg5[%c3_25, %c0_26, %c0_27], %36 {strides = array<i32>} : memref<8x8x128xf32, #tpu.memory_space<vmem>>, vector<1x8x128xf32>,
    %c4 = arith.constant 4 : index
    %c0_28 = arith.constant 0 : index
    %c0_29 = arith.constant 0 : index
    %37 = vector.load %arg2[%c4, %c0_28, %c0_29] : memref<8x8x128xf32, #tpu.memory_space<vmem>>, vector<1x8x128xf32>
    %38 = vector.shape_cast %37 : vector<1x8x128xf32> to vector<8x128xf32>
    %cst_30 = arith.constant dense<0.000000e+00> : vector<8x128xf32>
    %39 = tpu.matmul %33, %3, %cst_30 {dimension_numbers = #tpu.dot_dimension_numbers<[1], [0], [0], [1], [0, 0, 1, 1], [], []>} : vector<8x128xf32>, vector<128x128xf32>, vector<8x128xf32> -> vector<8x128xf32>
    %40 = arith.addf %38, %39 : vector<8x128xf32>
    %41 = math.tanh %40 : vector<8x128xf32>
    %c4_31 = arith.constant 4 : index
    %c0_32 = arith.constant 0 : index
    %c0_33 = arith.constant 0 : index
    %42 = vector.load %arg5[%c4_31, %c0_32, %c0_33] : memref<8x8x128xf32, #tpu.memory_space<vmem>>, vector<1x8x128xf32>
    %43 = vector.shape_cast %42 : vector<1x8x128xf32> to vector<8x128xf32>
    %44 = vector.shape_cast %41 : vector<8x128xf32> to vector<1x8x128xf32>
    tpu.vector_store %arg5[%c4_31, %c0_32, %c0_33], %44 {strides = array<i32>} : memref<8x8x128xf32, #tpu.memory_space<vmem>>, vector<1x8x128xf32>,
    %c5 = arith.constant 5 : index
    %c0_34 = arith.constant 0 : index
    %c0_35 = arith.constant 0 : index
    %45 = vector.load %arg2[%c5, %c0_34, %c0_35] : memref<8x8x128xf32, #tpu.memory_space<vmem>>, vector<1x8x128xf32>
    %46 = vector.shape_cast %45 : vector<1x8x128xf32> to vector<8x128xf32>
    %cst_36 = arith.constant dense<0.000000e+00> : vector<8x128xf32>
    %47 = tpu.matmul %41, %3, %cst_36 {dimension_numbers = #tpu.dot_dimension_numbers<[1], [0], [0], [1], [0, 0, 1, 1], [], []>} : vector<8x128xf32>, vector<128x128xf32>, vector<8x128xf32> -> vector<8x128xf32>
    %48 = arith.addf %46, %47 : vector<8x128xf32>
    %49 = math.tanh %48 : vector<8x128xf32>
    %c5_37 = arith.constant 5 : index
    %c0_38 = arith.constant 0 : index
    %c0_39 = arith.constant 0 : index
    %50 = vector.load %arg5[%c5_37, %c0_38, %c0_39] : memref<8x8x128xf32, #tpu.memory_space<vmem>>, vector<1x8x128xf32>
    %51 = vector.shape_cast %50 : vector<1x8x128xf32> to vector<8x128xf32>
    %52 = vector.shape_cast %49 : vector<8x128xf32> to vector<1x8x128xf32>
    tpu.vector_store %arg5[%c5_37, %c0_38, %c0_39], %52 {strides = array<i32>} : memref<8x8x128xf32, #tpu.memory_space<vmem>>, vector<1x8x128xf32>,
    %c6 = arith.constant 6 : index
    %c0_40 = arith.constant 0 : index
    %c0_41 = arith.constant 0 : index
    %53 = vector.load %arg2[%c6, %c0_40, %c0_41] : memref<8x8x128xf32, #tpu.memory_space<vmem>>, vector<1x8x128xf32>
    %54 = vector.shape_cast %53 : vector<1x8x128xf32> to vector<8x128xf32>
    %cst_42 = arith.constant dense<0.000000e+00> : vector<8x128xf32>
    %55 = tpu.matmul %49, %3, %cst_42 {dimension_numbers = #tpu.dot_dimension_numbers<[1], [0], [0], [1], [0, 0, 1, 1], [], []>} : vector<8x128xf32>, vector<128x128xf32>, vector<8x128xf32> -> vector<8x128xf32>
    %56 = arith.addf %54, %55 : vector<8x128xf32>
    %57 = math.tanh %56 : vector<8x128xf32>
    %c6_43 = arith.constant 6 : index
    %c0_44 = arith.constant 0 : index
    %c0_45 = arith.constant 0 : index
    %58 = vector.load %arg5[%c6_43, %c0_44, %c0_45] : memref<8x8x128xf32, #tpu.memory_space<vmem>>, vector<1x8x128xf32>
    %59 = vector.shape_cast %58 : vector<1x8x128xf32> to vector<8x128xf32>
    %60 = vector.shape_cast %57 : vector<8x128xf32> to vector<1x8x128xf32>
    tpu.vector_store %arg5[%c6_43, %c0_44, %c0_45], %60 {strides = array<i32>} : memref<8x8x128xf32, #tpu.memory_space<vmem>>, vector<1x8x128xf32>,
    %c7 = arith.constant 7 : index
    %c0_46 = arith.constant 0 : index
    %c0_47 = arith.constant 0 : index
    %61 = vector.load %arg2[%c7, %c0_46, %c0_47] : memref<8x8x128xf32, #tpu.memory_space<vmem>>, vector<1x8x128xf32>
    %62 = vector.shape_cast %61 : vector<1x8x128xf32> to vector<8x128xf32>
    %cst_48 = arith.constant dense<0.000000e+00> : vector<8x128xf32>
    %63 = tpu.matmul %57, %3, %cst_48 {dimension_numbers = #tpu.dot_dimension_numbers<[1], [0], [0], [1], [0, 0, 1, 1], [], []>} : vector<8x128xf32>, vector<128x128xf32>, vector<8x128xf32> -> vector<8x128xf32>
    %64 = arith.addf %62, %63 : vector<8x128xf32>
    %65 = math.tanh %64 : vector<8x128xf32>
    %c7_49 = arith.constant 7 : index
    %c0_50 = arith.constant 0 : index
    %c0_51 = arith.constant 0 : index
    %66 = vector.load %arg5[%c7_49, %c0_50, %c0_51] : memref<8x8x128xf32, #tpu.memory_space<vmem>>, vector<1x8x128xf32>
    %67 = vector.shape_cast %66 : vector<1x8x128xf32> to vector<8x128xf32>
    %68 = vector.shape_cast %65 : vector<8x128xf32> to vector<1x8x128xf32>
    tpu.vector_store %arg5[%c7_49, %c0_50, %c0_51], %68 {strides = array<i32>} : memref<8x8x128xf32, #tpu.memory_space<vmem>>, vector<1x8x128xf32>,
    %c0_52 = arith.constant 0 : index
    %c0_53 = arith.constant 0 : index
    %69 = vector.load %arg6[%c0_52, %c0_53] : memref<8x128xf32, #tpu.memory_space<vmem>>, vector<8x128xf32>
    tpu.vector_store %arg6[%c0_52, %c0_53], %65 {strides = array<i32>} : memref<8x128xf32, #tpu.memory_space<vmem>>, vector<8x128xf32>,
    return
  }
  func.func @transform_0(%arg0: i32, %arg1: i32) -> (i32, i32, i32) {
    %c0_i32 = arith.constant 0 : i32
    %c0_i32_0 = arith.constant 0 : i32
    return %arg1, %arg0, %c0_i32 : i32, i32, i32
  }
  func.func @transform_1(%arg0: i32, %arg1: i32) -> (i32, i32) {
    %c0_i32 = arith.constant 0 : i32
    %c0_i32_0 = arith.constant 0 : i32
    return %arg0, %c0_i32 : i32, i32
  }
  func.func @transform_2(%arg0: i32, %arg1: i32) -> (i32, i32) {
    %c0_i32 = arith.constant 0 : i32
    %c0_i32_0 = arith.constant 0 : i32
    %c0_i32_1 = arith.constant 0 : i32
    return %c0_i32, %c0_i32_0 : i32, i32
  }
  func.func @transform_3(%arg0: i32, %arg1: i32) -> (i32, i32, i32) {
    %c0_i32 = arith.constant 0 : i32
    %c0_i32_0 = arith.constant 0 : i32
    return %arg1, %arg0, %c0_i32 : i32, i32, i32
  }
}

</mosaic_0001>

<bundles_post_ra>
// kernel: vanilla_rnn_forward.1
= control target key start
LH: loop header
LB: loop body
LE: loop exit
PB: predicated region body
PF: predicated region fallthrough
CT: control target
= control target key end

     0   :  { %v1289_v0 = vmov 0.0|0.0   ;;  %vm1290_vm0 = vmmov 0   ;;  %v1291_v4 = vmov 0.0   ;;  %s1571_s2 = inlined_call_operand.vmem [shape: f32[128,128], index: 2, kind: input, shape index: {}]   ;;  %s1572_s1 = inlined_call_operand.vmem [shape: f32[8,128], index: 1, kind: input, shape index: {}]   ;;  %s1573_s0 = inlined_call_operand.vmem [shape: f32[8,8,128], index: 0, kind: input, shape index: {}]   ;;  %s1574_s3 = inlined_call_operand.vmem [shape: f32[8,8,128], index: 3, kind: output, shape index: {}]  }
   0x1   :  { %1078 = vmatprep.subr.bf16.mxu0 %v1289_v0  ;;  %v20_v1 = vld [vmem:[%s1571_s2] sm:$0xff]  ;;  %v21_v2 = vld [vmem:[%s1571_s2 + $0x8] sm:$0xff]  ;;  %v22_v3 = vld [vmem:[%s1571_s2 + $0x10] sm:$0xff]  ;;  %830 = vmatprep.mubr.msk.f32.mxu0 %vm1290_vm0, %v1291_v4 }
   0x2   :  { %v1324_v5 = vpack.c.bf16 %v21_v2, %v20_v1  ;;  %v23_v6 = vld [vmem:[%s1571_s2 + $0x18] sm:$0xff]  ;;  %1102 = vmatprep.subr.bf16.mxu1 %v1289_v0  ;;  %865 = vmatprep.mubr.msk.f32.mxu1 %vm1290_vm0, %v1291_v4  ;;  %v24_v8 = vld [vmem:[%s1571_s2 + $0x20] sm:$0xff]  ;;  %v25_v9 = vld [vmem:[%s1571_s2 + $0x28] sm:$0xff] }
   0x3   :  { %v1333_v7 = vpack.c.bf16 %v23_v6, %v22_v3  ;;  %v1345_v10 = vpack.c.bf16 %v25_v9, %v24_v8  ;;  %v26_v11 = vld [vmem:[%s1571_s2 + $0x30] sm:$0xff]  ;;  %v27_v12 = vld [vmem:[%s1571_s2 + $0x38] sm:$0xff]  ;;  %v28_v14 = vld [vmem:[%s1571_s2 + $0x40] sm:$0xff] }
   0x4   :  { %1080 = vmatpush3.bf16.msra.mxu0 %v1324_v5  ;;  %1104 = vmatpush3.bf16.msra.mxu1 %v1324_v5  ;;  %v1357_v13 = vpack.c.bf16 %v27_v12, %v26_v11  ;;  %v29_v15 = vld [vmem:[%s1571_s2 + $0x48] sm:$0xff]  ;;  %v30_v17 = vld [vmem:[%s1571_s2 + $0x50] sm:$0xff]  ;;  %v31_v18 = vld [vmem:[%s1571_s2 + $0x58] sm:$0xff] }
   0x5   :  { %1081 = vmatprep.subr.bf16.mxu0 %v1289_v0  ;;  %1105 = vmatprep.subr.bf16.mxu1 %v1289_v0  ;;  %v1369_v16 = vpack.c.bf16 %v29_v15, %v28_v14  ;;  %v1381_v19 = vpack.c.bf16 %v31_v18, %v30_v17  ;;  %v32_v20 = vld [vmem:[%s1571_s2 + $0x60] sm:$0xff]  ;;  %v33_v21 = vld [vmem:[%s1571_s2 + $0x68] sm:$0xff]  ;;  %v34_v23 = vld [vmem:[%s1571_s2 + $0x70] sm:$0xff] }
   0x6   :  { %v1393_v22 = vpack.c.bf16 %v33_v21, %v32_v20  ;;  %v35_v24 = vld [vmem:[%s1571_s2 + $0x78] sm:$0xff]  ;;  %v18_v26 = vld [vmem:[%s1572_s1] sm:$0xff]  ;;  %v648_v32 = vld [vmem:[%s1573_s0 + $0x8] sm:$0xff] }
   0x7   :  { %v1405_v25 = vpack.c.bf16 %v35_v24, %v34_v23  ;;  %v37_v27 = vld [vmem:[%s1573_s0] sm:$0xff]  ;;  %v650_v37 = vld [vmem:[%s1573_s0 + $0x10] sm:$0xff]  ;;  %v652_v42 = vld [vmem:[%s1573_s0 + $0x18] sm:$0xff] }
   0x8   :  { %1083 = vmatpush3.bf16.msra.mxu0 %v1333_v7  ;;  %1107 = vmatpush3.bf16.msra.mxu1 %v1333_v7  ;;  %v654_v47 = vld [vmem:[%s1573_s0 + $0x20] sm:$0xff]  ;;  %v656_v52 = vld [vmem:[%s1573_s0 + $0x28] sm:$0xff]  ;;  %v658_v57 = vld [vmem:[%s1573_s0 + $0x30] sm:$0xff] }
   0x9   :  { %1084 = vmatprep.subr.bf16.mxu0 %v1289_v0  ;;  %1108 = vmatprep.subr.bf16.mxu1 %v1289_v0  ;;  %v660_v62 = vld [vmem:[%s1573_s0 + $0x38] sm:$0xff] }
   0xc   :  { %1086 = vmatpush3.bf16.msra.mxu0 %v1345_v10  ;;  %1110 = vmatpush3.bf16.msra.mxu1 %v1345_v10 }
   0xd   :  { %1087 = vmatprep.subr.bf16.mxu0 %v1289_v0  ;;  %1111 = vmatprep.subr.bf16.mxu1 %v1289_v0 }
  0x10   :  { %1089 = vmatpush3.bf16.msra.mxu0 %v1357_v13  ;;  %1113 = vmatpush3.bf16.msra.mxu1 %v1357_v13 }
  0x11   :  { %1090 = vmatprep.subr.bf16.mxu0 %v1289_v0  ;;  %1114 = vmatprep.subr.bf16.mxu1 %v1289_v0 }
  0x14   :  { %1092 = vmatpush3.bf16.msra.mxu0 %v1369_v16  ;;  %1116 = vmatpush3.bf16.msra.mxu1 %v1369_v16 }
  0x15   :  { %1093 = vmatprep.subr.bf16.mxu0 %v1289_v0  ;;  %1117 = vmatprep.subr.bf16.mxu1 %v1289_v0 }
  0x18   :  { %1095 = vmatpush3.bf16.msra.mxu0 %v1381_v19  ;;  %1119 = vmatpush3.bf16.msra.mxu1 %v1381_v19 }
  0x19   :  { %1096 = vmatprep.subr.bf16.mxu0 %v1289_v0  ;;  %1120 = vmatprep.subr.bf16.mxu1 %v1289_v0 }
  0x1c   :  { %1098 = vmatpush3.bf16.msra.mxu0 %v1393_v22  ;;  %1122 = vmatpush3.bf16.msra.mxu1 %v1393_v22 }
  0x1d   :  { %1099 = vmatprep.subr.bf16.mxu0 %v1289_v0  ;;  %1123 = vmatprep.subr.bf16.mxu1 %v1289_v0 }
  0x20   :  { %1101 = vmatpush3.bf16.msra.mxu0 %v1405_v25  ;;  %1125 = vmatpush3.bf16.msra.mxu1 %v1405_v25 }
  0x21   :  { %1126 = vmatprep.subr.bf16.mxu0 %v1289_v0  ;;  %1150 = vmatprep.subr.bf16.mxu1 %v1289_v0 }
  0x23   :  { %831 = vmatmul.mubr.f32.vlgmr.msra.gmra.mrb[0].mxu0 %v18_v26 }
  0x24   :  { %1128 = vmatpush3.bf16.msra.mxu0 %v1324_v5  ;;  %900 = vmatprep.mubr.msk.f32.mxu0 %vm1290_vm0, %v1291_v4 }
  0x25   :  { %1129 = vmatprep.subr.bf16.mxu0 %v1289_v0 }
  0x28   :  { %1131 = vmatpush3.bf16.msra.mxu0 %v1333_v7 }
  0x29   :  { %1132 = vmatprep.subr.bf16.mxu0 %v1289_v0 }
  0x2c   :  { %1134 = vmatpush3.bf16.msra.mxu0 %v1345_v10 }
  0x2d   :  { %1135 = vmatprep.subr.bf16.mxu0 %v1289_v0 }
  0x30   :  { %1137 = vmatpush3.bf16.msra.mxu0 %v1357_v13 }
  0x31   :  { %1138 = vmatprep.subr.bf16.mxu0 %v1289_v0 }
  0x34   :  { %1140 = vmatpush3.bf16.msra.mxu0 %v1369_v16 }
  0x35   :  { %1141 = vmatprep.subr.bf16.mxu0 %v1289_v0 }
  0x38   :  { %1143 = vmatpush3.bf16.msra.mxu0 %v1381_v19 }
  0x39   :  { %1144 = vmatprep.subr.bf16.mxu0 %v1289_v0 }
  0x3c   :  { %1146 = vmatpush3.bf16.msra.mxu0 %v1393_v22 }
  0x3d   :  { %1147 = vmatprep.subr.bf16.mxu0 %v1289_v0 }
  0x40   :  { %1149 = vmatpush3.bf16.msra.mxu0 %v1405_v25 }
  0x41   :  { %1174 = vmatprep.subr.bf16.mxu0 %v1289_v0 }
  0xf6   :  { %v104_v28 = vpop.f32.mrb[0].mxu0 }
  0xf7   :  { %v108_v29 = vadd.f32 %v104_v28, %v37_v27  ;;  %v832_v30 = vpop.f32.mrb[1].mxu0 }
  0xf9   :  { %1273 = vtanh.f32 %v108_v29 }
 0x103   :  { %v1274_v31 = vpop.eup %1273 }
 0x104   :  { %110 = vst [vmem:[%s1574_s3] sm:$0xff] %v1274_v31  ;;  %866 = vmatmul.mubr.f32.vlgmr.msra.gmra.mrb[0].mxu1 %v1274_v31 }
 0x105   :  { %1152 = vmatpush3.bf16.msra.mxu1 %v1324_v5  ;;  %935 = vmatprep.mubr.msk.f32.mxu1 %vm1290_vm0, %v1291_v4 }
 0x106   :  { %1153 = vmatprep.subr.bf16.mxu1 %v1289_v0 }
 0x109   :  { %1155 = vmatpush3.bf16.msra.mxu1 %v1333_v7 }
 0x10a   :  { %1156 = vmatprep.subr.bf16.mxu1 %v1289_v0 }
 0x10d   :  { %1158 = vmatpush3.bf16.msra.mxu1 %v1345_v10 }
 0x10e   :  { %1159 = vmatprep.subr.bf16.mxu1 %v1289_v0 }
 0x111   :  { %1161 = vmatpush3.bf16.msra.mxu1 %v1357_v13 }
 0x112   :  { %1162 = vmatprep.subr.bf16.mxu1 %v1289_v0 }
 0x115   :  { %1164 = vmatpush3.bf16.msra.mxu1 %v1369_v16 }
 0x116   :  { %1165 = vmatprep.subr.bf16.mxu1 %v1289_v0 }
 0x119   :  { %1167 = vmatpush3.bf16.msra.mxu1 %v1381_v19 }
 0x11a   :  { %1168 = vmatprep.subr.bf16.mxu1 %v1289_v0 }
 0x11d   :  { %1170 = vmatpush3.bf16.msra.mxu1 %v1393_v22 }
 0x11e   :  { %1171 = vmatprep.subr.bf16.mxu1 %v1289_v0 }
 0x121   :  { %1173 = vmatpush3.bf16.msra.mxu1 %v1405_v25 }
 0x122   :  { %1198 = vmatprep.subr.bf16.mxu1 %v1289_v0 }
 0x1d7   :  { %v179_v33 = vpop.f32.mrb[0].mxu1 }
 0x1d8   :  { %v183_v34 = vadd.f32 %v648_v32, %v179_v33  ;;  %v867_v35 = vpop.f32.mrb[1].mxu1 }
 0x1da   :  { %1275 = vtanh.f32 %v183_v34 }
 0x1e4   :  { %v1276_v36 = vpop.eup %1275 }
 0x1e5   :  { %649 = vst [vmem:[%s1574_s3 + $0x8] sm:$0xff] %v1276_v36  ;;  %901 = vmatmul.mubr.f32.vlgmr.msra.gmra.mrb[2].mxu0 %v1276_v36 }
 0x1e6   :  { %1176 = vmatpush3.bf16.msra.mxu0 %v1324_v5  ;;  %970 = vmatprep.mubr.msk.f32.mxu0 %vm1290_vm0, %v1291_v4 }
 0x1e7   :  { %1177 = vmatprep.subr.bf16.mxu0 %v1289_v0 }
 0x1ea   :  { %1179 = vmatpush3.bf16.msra.mxu0 %v1333_v7 }
 0x1eb   :  { %1180 = vmatprep.subr.bf16.mxu0 %v1289_v0 }
 0x1ee   :  { %1182 = vmatpush3.bf16.msra.mxu0 %v1345_v10 }
 0x1ef   :  { %1183 = vmatprep.subr.bf16.mxu0 %v1289_v0 }
 0x1f2   :  { %1185 = vmatpush3.bf16.msra.mxu0 %v1357_v13 }
 0x1f3   :  { %1186 = vmatprep.subr.bf16.mxu0 %v1289_v0 }
 0x1f6   :  { %1188 = vmatpush3.bf16.msra.mxu0 %v1369_v16 }
 0x1f7   :  { %1189 = vmatprep.subr.bf16.mxu0 %v1289_v0 }
 0x1fa   :  { %1191 = vmatpush3.bf16.msra.mxu0 %v1381_v19 }
 0x1fb   :  { %1192 = vmatprep.subr.bf16.mxu0 %v1289_v0 }
 0x1fe   :  { %1194 = vmatpush3.bf16.msra.mxu0 %v1393_v22 }
 0x1ff   :  { %1195 = vmatprep.subr.bf16.mxu0 %v1289_v0 }
 0x202   :  { %1197 = vmatpush3.bf16.msra.mxu0 %v1405_v25 }
 0x203   :  { %1222 = vmatprep.subr.bf16.mxu0 %v1289_v0 }
 0x2b8   :  { %v255_v38 = vpop.f32.mrb[2].mxu0 }
 0x2b9   :  { %v259_v39 = vadd.f32 %v650_v37, %v255_v38  ;;  %v902_v40 = vpop.f32.mrb[3].mxu0 }
 0x2bb   :  { %1277 = vtanh.f32 %v259_v39 }
 0x2c5   :  { %v1278_v41 = vpop.eup %1277 }
 0x2c6   :  { %651 = vst [vmem:[%s1574_s3 + $0x10] sm:$0xff] %v1278_v41  ;;  %936 = vmatmul.mubr.f32.vlgmr.msra.gmra.mrb[2].mxu1 %v1278_v41 }
 0x2c7   :  { %1200 = vmatpush3.bf16.msra.mxu1 %v1324_v5  ;;  %1005 = vmatprep.mubr.msk.f32.mxu1 %vm1290_vm0, %v1291_v4 }
 0x2c8   :  { %1201 = vmatprep.subr.bf16.mxu1 %v1289_v0 }
 0x2cb   :  { %1203 = vmatpush3.bf16.msra.mxu1 %v1333_v7 }
 0x2cc   :  { %1204 = vmatprep.subr.bf16.mxu1 %v1289_v0 }
 0x2cf   :  { %1206 = vmatpush3.bf16.msra.mxu1 %v1345_v10 }
 0x2d0   :  { %1207 = vmatprep.subr.bf16.mxu1 %v1289_v0 }
 0x2d3   :  { %1209 = vmatpush3.bf16.msra.mxu1 %v1357_v13 }
 0x2d4   :  { %1210 = vmatprep.subr.bf16.mxu1 %v1289_v0 }
 0x2d7   :  { %1212 = vmatpush3.bf16.msra.mxu1 %v1369_v16 }
 0x2d8   :  { %1213 = vmatprep.subr.bf16.mxu1 %v1289_v0 }
 0x2db   :  { %1215 = vmatpush3.bf16.msra.mxu1 %v1381_v19 }
 0x2dc   :  { %1216 = vmatprep.subr.bf16.mxu1 %v1289_v0 }
 0x2df   :  { %1218 = vmatpush3.bf16.msra.mxu1 %v1393_v22 }
 0x2e0   :  { %1219 = vmatprep.subr.bf16.mxu1 %v1289_v0 }
 0x2e3   :  { %1221 = vmatpush3.bf16.msra.mxu1 %v1405_v25 }
 0x2e4   :  { %1246 = vmatprep.subr.bf16.mxu1 %v1289_v0 }
 0x399   :  { %v331_v43 = vpop.f32.mrb[2].mxu1 }
 0x39a   :  { %v335_v44 = vadd.f32 %v652_v42, %v331_v43  ;;  %v937_v45 = vpop.f32.mrb[3].mxu1 }
 0x39c   :  { %1279 = vtanh.f32 %v335_v44 }
 0x3a6   :  { %v1280_v46 = vpop.eup %1279 }
 0x3a7   :  { %653 = vst [vmem:[%s1574_s3 + $0x18] sm:$0xff] %v1280_v46  ;;  %971 = vmatmul.mubr.f32.vlgmr.msra.gmra.mrb[4].mxu0 %v1280_v46 }
 0x3a8   :  { %1224 = vmatpush3.bf16.msra.mxu0 %v1324_v5  ;;  %1040 = vmatprep.mubr.msk.f32.mxu0 %vm1290_vm0, %v1291_v4 }
 0x3a9   :  { %1225 = vmatprep.subr.bf16.mxu0 %v1289_v0 }
 0x3ac   :  { %1227 = vmatpush3.bf16.msra.mxu0 %v1333_v7 }
 0x3ad   :  { %1228 = vmatprep.subr.bf16.mxu0 %v1289_v0 }
 0x3b0   :  { %1230 = vmatpush3.bf16.msra.mxu0 %v1345_v10 }
 0x3b1   :  { %1231 = vmatprep.subr.bf16.mxu0 %v1289_v0 }
 0x3b4   :  { %1233 = vmatpush3.bf16.msra.mxu0 %v1357_v13 }
 0x3b5   :  { %1234 = vmatprep.subr.bf16.mxu0 %v1289_v0 }
 0x3b8   :  { %1236 = vmatpush3.bf16.msra.mxu0 %v1369_v16 }
 0x3b9   :  { %1237 = vmatprep.subr.bf16.mxu0 %v1289_v0 }
 0x3bc   :  { %1239 = vmatpush3.bf16.msra.mxu0 %v1381_v19 }
 0x3bd   :  { %1240 = vmatprep.subr.bf16.mxu0 %v1289_v0 }
 0x3c0   :  { %1242 = vmatpush3.bf16.msra.mxu0 %v1393_v22 }
 0x3c1   :  { %1243 = vmatprep.subr.bf16.mxu0 %v1289_v0 }
 0x3c4   :  { %1245 = vmatpush3.bf16.msra.mxu0 %v1405_v25 }
 0x47a   :  { %v407_v48 = vpop.f32.mrb[4].mxu0 }
 0x47b   :  { %v411_v49 = vadd.f32 %v654_v47, %v407_v48  ;;  %v972_v50 = vpop.f32.mrb[5].mxu0 }
 0x47d   :  { %1281 = vtanh.f32 %v411_v49 }
 0x487   :  { %v1282_v51 = vpop.eup %1281 }
 0x488   :  { %655 = vst [vmem:[%s1574_s3 + $0x20] sm:$0xff] %v1282_v51  ;;  %1006 = vmatmul.mubr.f32.vlgmr.msra.gmra.mrb[4].mxu1 %v1282_v51 }
 0x489   :  { %1248 = vmatpush3.bf16.msra.mxu1 %v1324_v5  ;;  %1075 = vmatprep.mubr.msk.f32.mxu1 %vm1290_vm0, %v1291_v4 }
 0x48a   :  { %1249 = vmatprep.subr.bf16.mxu1 %v1289_v0 }
 0x48d   :  { %1251 = vmatpush3.bf16.msra.mxu1 %v1333_v7 }
 0x48e   :  { %1252 = vmatprep.subr.bf16.mxu1 %v1289_v0 }
 0x491   :  { %1254 = vmatpush3.bf16.msra.mxu1 %v1345_v10 }
 0x492   :  { %1255 = vmatprep.subr.bf16.mxu1 %v1289_v0 }
 0x495   :  { %1257 = vmatpush3.bf16.msra.mxu1 %v1357_v13 }
 0x496   :  { %1258 = vmatprep.subr.bf16.mxu1 %v1289_v0 }
 0x499   :  { %1260 = vmatpush3.bf16.msra.mxu1 %v1369_v16 }
 0x49a   :  { %1261 = vmatprep.subr.bf16.mxu1 %v1289_v0 }
 0x49d   :  { %1263 = vmatpush3.bf16.msra.mxu1 %v1381_v19 }
 0x49e   :  { %1264 = vmatprep.subr.bf16.mxu1 %v1289_v0 }
 0x4a1   :  { %1266 = vmatpush3.bf16.msra.mxu1 %v1393_v22 }
 0x4a2   :  { %1267 = vmatprep.subr.bf16.mxu1 %v1289_v0 }
 0x4a5   :  { %1269 = vmatpush3.bf16.msra.mxu1 %v1405_v25 }
 0x55b   :  { %v483_v53 = vpop.f32.mrb[4].mxu1 }
 0x55c   :  { %v487_v54 = vadd.f32 %v656_v52, %v483_v53  ;;  %v1007_v55 = vpop.f32.mrb[5].mxu1 }
 0x55e   :  { %1283 = vtanh.f32 %v487_v54 }
 0x568   :  { %v1284_v56 = vpop.eup %1283 }
 0x569   :  { %657 = vst [vmem:[%s1574_s3 + $0x28] sm:$0xff] %v1284_v56  ;;  %1041 = vmatmul.mubr.f32.vlgmr.msra.gmra.mrb[6].mxu0 %v1284_v56 }
 0x63c   :  { %v559_v58 = vpop.f32.mrb[6].mxu0 }
 0x63d   :  { %v563_v59 = vadd.f32 %v658_v57, %v559_v58  ;;  %v1042_v60 = vpop.f32.mrb[7].mxu0 }
 0x63f   :  { %1285 = vtanh.f32 %v563_v59 }
 0x649   :  { %v1286_v61 = vpop.eup %1285 }
 0x64a   :  { %659 = vst [vmem:[%s1574_s3 + $0x30] sm:$0xff] %v1286_v61  ;;  %1076 = vmatmul.mubr.f32.vlgmr.msra.gmra.mrb[6].mxu1 %v1286_v61 }
 0x71d   :  { %v635_v63 = vpop.f32.mrb[6].mxu1 }
 0x71e   :  { %v639_v0 = vadd.f32 %v660_v62, %v635_v63  ;;  %v1077_v1 = vpop.f32.mrb[7].mxu1 }
 0x720   :  { %1287 = vtanh.f32 %v639_v0 }
 0x72a   :  { %v1288_v2 = vpop.eup %1287 }
 0x72b   :  { %661 = vst [vmem:[%s1574_s3 + $0x38] sm:$0xff] %v1288_v2 }

</bundles_post_ra>
